<compile_context>
chip_gen: v5e
topology: v5e:2x2
jax: 0.10.0
libtpu: 0.0.40
codegen_flags: <defaults>
</compile_context>

<pallas_src>
import math

import jax
import jax.numpy as jnp
from jax.experimental import pallas as pl
from jax.experimental.pallas import tpu as pltpu

_SHIFT = math.log(2.0)  # Python float literal -> inlined constant in the kernel.

_LANE_CANDIDATES = (4096, 2048, 1024, 512, 256, 128)


def _make_kernel(compute_dtype):
    def shifted_softplus_kernel(x_ref, o_ref):
        x = x_ref[...].astype(compute_dtype)
        # Numerically stable softplus; matches PyTorch softplus(threshold=20).
        sp = jnp.maximum(x, 0) + jnp.log1p(jnp.exp(-jnp.abs(x)))
        o_ref[...] = (sp - _SHIFT).astype(o_ref.dtype)

    return shifted_softplus_kernel


def _shifted_softplus_jnp(x):
    # Fused-XLA fast path for tiny tensors.
    xf = x.astype(jnp.float32)
    sp = jnp.maximum(xf, 0.0) + jnp.log1p(jnp.exp(-jnp.abs(xf)))
    return (sp - _SHIFT).astype(x.dtype)


def _sublane_multiple(dtype) -> int:
    # Sub-32-bit dtypes pack along sublanes: f32 -> 8, bf16 -> 16, fp8 -> 32.
    bits = jnp.dtype(dtype).itemsize * 8
    return max(8, 256 // bits)


def _choose_lanes(total):
    """Largest lane width (multiple of 128) that divides `total` -> no padding."""
    for cand in _LANE_CANDIDATES:
        if total % cand == 0:
            return cand, False
    return 128, True  # ragged total: pad up to a multiple of 128 (rare)


def _choose_block_rows(rows, lanes, itemsize, sub, target_block_bytes):
    bytes_per_row = lanes * itemsize
    total_bytes = rows * bytes_per_row
    # Largest block that respects the per-block VMEM target.
    max_block_rows = max(sub, (target_block_bytes // bytes_per_row) // sub * sub)
    steps = pl.cdiv(rows, max_block_rows)
    # Enough steps for software pipelining on each of (up to) 2 TensorCores,
    # but only when there is enough work to amortize ~0.35 us/step overhead.
    if total_bytes >= (8 << 20):
        steps = max(steps, 4)
    elif total_bytes >= (2 << 20):
        steps = max(steps, 2)
    # Even step count so two TensorCores don't get a lopsided split.
    if steps > 1 and steps % 2:
        steps += 1
    block_rows = max(sub, pl.cdiv(pl.cdiv(rows, steps), sub) * sub)
    if block_rows >= rows:
        # Single block: use the exact row count ("equals full dim" is always a
        # legal block shape) so we never request a block larger than the array.
        block_rows = rows
    return block_rows


def shifted_softplus(
    x,
    *,
    target_block_bytes=4 * 1024 * 1024,
    small_input_threshold_bytes=256 * 1024,
    compute_dtype=jnp.float32,
    donate_input=False,
):
    """ShiftedSoftplus applied elementwise to an array of any shape.

    compute_dtype: keep jnp.float32 (safe on all TPU generations). bf16 users
    on v6e/v7x may pass jnp.bfloat16 to double EUP transcendental throughput.
    donate_input: set True only if the caller no longer needs `x`.
    """
    if not jnp.issubdtype(x.dtype, jnp.floating):
        raise TypeError(f"shifted_softplus expects a floating dtype, got {x.dtype}")

    orig_shape = x.shape
    orig_dtype = x.dtype
    total = x.size
    if total == 0:
        return x

    itemsize = jnp.dtype(orig_dtype).itemsize
    if total * itemsize < small_input_threshold_bytes:
        return _shifted_softplus_jnp(x)

    sub = _sublane_multiple(orig_dtype)
    lanes, needs_pad = _choose_lanes(total)

    if needs_pad:
        # Ragged total: single small pad to a multiple of 128 (one extra HBM
        # pass; only hit when total % 128 != 0).
        rows = pl.cdiv(total, lanes)
        x_flat = jnp.pad(x.reshape(-1), (0, rows * lanes - total))
        x2 = x_flat.reshape(rows, lanes)
    else:
        rows = total // lanes
        x2 = x.reshape(rows, lanes)  # free bitcast reshape, no pad, no slice

    block_rows = _choose_block_rows(rows, lanes, itemsize, sub, target_block_bytes)
    grid = (pl.cdiv(rows, block_rows),)

    y2 = pl.pallas_call(
        _make_kernel(compute_dtype),
        out_shape=jax.ShapeDtypeStruct((rows, lanes), orig_dtype),
        grid=grid,
        in_specs=[pl.BlockSpec((block_rows, lanes), lambda i: (i, 0))],
        out_specs=pl.BlockSpec((block_rows, lanes), lambda i: (i, 0)),
        compiler_params=pltpu.CompilerParams(
            dimension_semantics=("parallel",),
            vmem_limit_bytes=32 * 1024 * 1024,
        ),
        input_output_aliases={0: 0} if donate_input else {},
    )(x2)

    if needs_pad:
        return y2.reshape(-1)[:total].reshape(orig_shape)
    return y2.reshape(orig_shape)


def _reference(x):
    # PyTorch F.softplus(threshold=20) - log(2), in f32, cast back.
    xf = x.astype(jnp.float32)
    stable = jnp.maximum(xf, 0.0) + jnp.log1p(jnp.exp(-jnp.abs(xf)))
    sp = jnp.where(xf > 20.0, xf, stable)
    return (sp - _SHIFT).astype(x.dtype)


if __name__ == "__main__":
    key = jax.random.PRNGKey(0)
    k1, k2, k3, k4 = jax.random.split(key, 4)

    # 1) Canonical SchNet feature block (nodes x hidden).  Small enough that
    #    the default wrapper takes the fused-XLA fast path; also force the
    #    Pallas kernel path to validate it at this shape.
    x1 = jax.random.normal(k1, (16, 128), dtype=jnp.float32) * 5.0
    r1 = _reference(x1)
    y1_fast = jax.block_until_ready(shifted_softplus(x1))
    y1_kern = jax.block_until_ready(
        shifted_softplus(x1, small_input_threshold_bytes=0))
    assert y1_kern.shape == x1.shape and y1_kern.dtype == x1.dtype
    assert jnp.allclose(y1_fast, r1, atol=1e-5, rtol=1e-5), "fast-path mismatch"
    assert jnp.allclose(y1_kern, r1, atol=1e-5, rtol=1e-5), "kernel mismatch"

    # 2) Larger activation -> kernel path with zero padding (total % 128 == 0).
    #    Second call shrinks the block to exercise a multi-step grid with a
    #    partial last block (edge-block masking).
    x2 = jax.random.normal(k2, (72, 1024), dtype=jnp.float32) * 10.0
    r2 = _reference(x2)
    y2 = jax.block_until_ready(shifted_softplus(x2))
    y2_multi = jax.block_until_ready(
        shifted_softplus(x2, target_block_bytes=64 * 1024))
    assert jnp.allclose(y2, r2, atol=1e-5, rtol=1e-5), "no-pad path mismatch"
    assert jnp.allclose(y2_multi, r2, atol=1e-5, rtol=1e-5), "multi-block mismatch"

    # 3) Ragged shape (total not a multiple of 128) -> minimal pad fallback.
    x3 = jax.random.normal(k3, (3, 7, 33), dtype=jnp.float32) * 10.0
    y3 = jax.block_until_ready(
        shifted_softplus(x3, small_input_threshold_bytes=0))
    assert y3.shape == x3.shape and y3.dtype == x3.dtype
    assert jnp.allclose(y3, _reference(x3), atol=1e-5, rtol=1e-5), "ragged mismatch"

    # 4) bf16 input (f32 internal compute: safe on v5e/v6e/v7x alike).
    x4 = (jax.random.normal(k4, (32, 512), dtype=jnp.float32) * 5.0).astype(
        jnp.bfloat16)
    y4 = jax.block_until_ready(
        shifted_softplus(x4, small_input_threshold_bytes=0))
    assert y4.shape == x4.shape and y4.dtype == jnp.bfloat16
    assert jnp.allclose(
        y4.astype(jnp.float32), _reference(x4).astype(jnp.float32),
        atol=2e-2, rtol=2e-2), "bf16 mismatch"

    print("KERNEL_OK")
</pallas_src>

<mosaic_0001>
module attributes {stable_mosaic.version = 11 : i64} {
  func.func @shifted_softplus_kernel(%arg0: i32, %arg1: memref<1x2048xf32, #tpu.memory_space<vmem>>, %arg2: memref<1x2048xf32, #tpu.memory_space<vmem>>) attributes {dimension_semantics = [#tpu.dimension_semantics<parallel>], iteration_bounds = array<i64: 1>, scalar_prefetch = 0 : i64, scratch_operands = 0 : i64, tpu.core_type = #tpu.core_type<tc>, window_params = [{transform_indices = @transform_0, window_bounds = array<i64: 1, 2048>}, {transform_indices = @transform_1, window_bounds = array<i64: 1, 2048>}]} {
    %c0 = arith.constant 0 : index
    %c0_0 = arith.constant 0 : index
    %0 = vector.load %arg1[%c0, %c0_0] : memref<1x2048xf32, #tpu.memory_space<vmem>>, vector<1x2048xf32>
    %cst = arith.constant 0.000000e+00 : f32
    %1 = vector.broadcast %cst : f32 to vector<1x2048xf32>
    %2 = arith.maximumf %0, %1 : vector<1x2048xf32>
    %3 = math.absf %0 : vector<1x2048xf32>
    %cst_1 = arith.constant 0.000000e+00 : f32
    %4 = vector.broadcast %cst_1 : f32 to vector<1x2048xf32>
    %5 = arith.subf %4, %3 : vector<1x2048xf32>
    %6 = math.exp %5 : vector<1x2048xf32>
    %7 = math.log1p %6 : vector<1x2048xf32>
    %8 = arith.addf %2, %7 : vector<1x2048xf32>
    %cst_2 = arith.constant 0.693147182 : f32
    %9 = vector.broadcast %cst_2 : f32 to vector<1x2048xf32>
    %10 = arith.subf %8, %9 : vector<1x2048xf32>
    %c0_3 = arith.constant 0 : index
    %c0_4 = arith.constant 0 : index
    %11 = vector.load %arg2[%c0_3, %c0_4] : memref<1x2048xf32, #tpu.memory_space<vmem>>, vector<1x2048xf32>
    tpu.vector_store %arg2[%c0_3, %c0_4], %10 {strides = array<i32>} : memref<1x2048xf32, #tpu.memory_space<vmem>>, vector<1x2048xf32>,
    return
  }
  func.func @transform_0(%arg0: i32) -> (i32, i32) {
    %c0_i32 = arith.constant 0 : i32
    %c0_i32_0 = arith.constant 0 : i32
    return %arg0, %c0_i32 : i32, i32
  }
  func.func @transform_1(%arg0: i32) -> (i32, i32) {
    %c0_i32 = arith.constant 0 : i32
    %c0_i32_0 = arith.constant 0 : i32
    return %arg0, %c0_i32 : i32, i32
  }
}

</mosaic_0001>

<bundles_post_ra>
// kernel: tpu_custom_call.1
= control target key start
LH: loop header
LB: loop body
LE: loop exit
PB: predicated region body
PF: predicated region fallthrough
CT: control target
= control target key end

     0   :  { %6 = vsyncpa [#allocation3], 0  ;;  %s158_s0 = inlined_call_operand.hbm [shape: f32[1,2048], index: 0, kind: input, shape index: {}]   ;;  %s159_s1 = inlined_call_operand.hbm [shape: f32[1,2048], index: 1, kind: output, shape index: {}]  }
   0x1   :  { %7 = vsyncpa [#allocation4], 0  ;;  %s13_s8 = sshll.u32 %s158_s0, 4  ;;  %s140_s9 = smov [#allocation2]   ;;  %s14_s8 = int_to_ptr.hbm [resolvable:$true] %s13_s8 }
   0x2   :  { %s15_s10 = sshll.u32 %s140_s9, 4  ;;  %s16_s10 = int_to_ptr.vmem [resolvable:$true] %s15_s10 }
   0x3   :  { %18 = dma.hbm_to_vmem [thread:$0]  %s14_s8, 256, %s16_s10, [#allocation3]  }
   0x4   :  { %136 = dma.done.wait [#allocation3], 256  }
   0x5   :  { %137 = vsyncadd [#allocation3], 4294967040  ;;  %v23_v0 = vld [vmem:[#allocation2] sm:$0xff]  ;;  %v24_v1 = vld [vmem:[#allocation2 + $0x8] sm:$0xff]  ;;  %s141_s0 = smov [#allocation5]   ;;  %s66_s14 = sshll.u32 %s159_s1, 4  ;;  %s67_s14 = int_to_ptr.hbm [resolvable:$true] %s66_s14 }
   0x6   :  { %v27_v2 = vand.u32 2147483647, %v23_v0  ;;  %v28_v3 = vand.u32 2147483647, %v24_v1  ;;  %v25_v20 = vmax.f32 %v23_v0, 0.0  ;;  %v26_v24 = vmax.f32 %v24_v1, 0.0 }
   0x7   :  { %s64_s11 = sshll.u32 %s141_s0, 4  ;;  %s65_s11 = int_to_ptr.vmem [resolvable:$true] %s64_s11 }
   0x8   :  { %v29_v4 = vsub.f32 0.0, %v27_v2  ;;  %v30_v5 = vsub.f32 0.0, %v28_v3 }
   0xa   :  { %v31_v6 = vmul.f32 1.442695, %v29_v4  ;;  %v33_v7 = vmul.f32 1.442695, %v30_v5 }
   0xc   :  { %80 = vpow2.f32 %v31_v6 }
   0xd   :  { %82 = vpow2.f32 %v33_v7 }
  0x12   :  { %v81_v8 = vpop.eup %80 }
  0x13   :  { %v83_v9 = vpop.eup %82  ;;  %v35_v10 = vadd.f32 1.0, %v81_v8  ;;  %v38_v11 = vmul.f32 -0.5, %v81_v8  ;;  %v41_v15 = vand.u32 2147483647, %v81_v8 }
  0x14   :  { %v44_v12 = vadd.f32 1.0, %v83_v9  ;;  %v47_v13 = vmul.f32 -0.5, %v83_v9  ;;  %v50_v17 = vand.u32 2147483647, %v83_v9 }
  0x15   :  { %84 = vlog2.f32 %v35_v10  ;;  %v39_v14 = vadd.f32 1.0, %v38_v11  ;;  %vm42_vm0 = vcmp.lt.f32.partialorder %v41_v15, 0.0004427343 }
  0x16   :  { %86 = vlog2.f32 %v44_v12  ;;  %v48_v16 = vadd.f32 1.0, %v47_v13  ;;  %vm51_vm1 = vcmp.lt.f32.partialorder %v50_v17, 0.0004427343 }
  0x17   :  { %v40_v18 = vmul.f32 %v81_v8, %v39_v14 }
  0x18   :  { %v49_v21 = vmul.f32 %v83_v9, %v48_v16 }
  0x1b   :  { %v85_v19 = vpop.eup %84 }
  0x1c   :  { %v87_v22 = vpop.eup %86  ;;  %v37_v23 = vmul.f32 0.6931472, %v85_v19 }
  0x1d   :  { %v46_v25 = vmul.f32 0.6931472, %v87_v22 }
  0x1e   :  { %v43_v26 = vsel %vm42_vm0, %v40_v18, %v37_v23 }
  0x1f   :  { %v53_v27 = vadd.f32 %v43_v26, %v25_v20  ;;  %v52_v28 = vsel %vm51_vm1, %v49_v21, %v46_v25 }
  0x20   :  { %v54_v29 = vadd.f32 %v52_v28, %v26_v24 }
  0x21   :  { %v76_v30 = vadd.f32 -0.6931472, %v53_v27 }
  0x22   :  { %v77_v31 = vadd.f32 -0.6931472, %v54_v29 }
  0x23   :  { %57 = vst [vmem:[#allocation5] sm:$0xff] %v76_v30 }
  0x24   :  { %58 = vst [vmem:[#allocation5 + $0x8] sm:$0xff] %v77_v31 }
  0x25   :  { %69 = dma.vmem_to_hbm [thread:$0]  %s65_s11, 256, %s67_s14, [#allocation4]  }
  0x26   :  { %138 = dma.done.wait [#allocation4], 256  }
  0x27   :  { %139 = vsyncadd [#allocation4], 4294967040 }
  0x28   :  { %74 = vsyncpa [#allocation3], 1 }
  0x29   :  { %75 = vsyncpa [#allocation4], 1 }

</bundles_post_ra>
